<compile_context>
chip_gen: v5e
topology: v5e:2x2
jax: 0.10.0
libtpu: 0.0.40
codegen_flags: <defaults>
</compile_context>

<pallas_src>
import functools
import math

import jax
import jax.numpy as jnp
import numpy as np
from jax.experimental import pallas as pl
from jax.experimental.pallas import tpu as pltpu


def _round_up(x, m):
    return (x + m - 1) // m * m


# --------------------------------------------------------------------------- #
# Kernel: one GACF layer  relu( L1 @ XW + b )  as a block-sparse contraction.
# --------------------------------------------------------------------------- #
def gacf_layer_kernel(cols_ref, cnt_ref, l1_ref, xw_ref, b_ref, o_ref, acc_ref):
    """grid = (row tiles of N [parallel], compacted nonzero col tiles [arbitrary])

    cols_ref : (ni*max_nnz,) int32 SMEM  compacted nonzero column-tile indices
    cnt_ref  : (ni,)         int32 SMEM  number of valid entries per row tile
    l1_ref   : (TM, TK) bf16             tile of (laplacianMat + selfLoop)
    xw_ref   : (TK, TP) bf16             tile of the hoisted X @ W^T (lane-padded)
    b_ref    : (1, TP)  f32              lane-padded bias row
    o_ref    : (TM, TP) bf16             output row tile (lane-dense, written once)
    acc_ref  : (TM, TP) f32              VMEM accumulator scratch
    """
    i = pl.program_id(0)
    kk = pl.program_id(1)

    @pl.when(kk == 0)
    def _init():
        acc_ref[...] = jnp.zeros_like(acc_ref)

    # Entries kk >= cnt[i] are padding: their index_map clamps to the previous
    # valid block (no new DMA); skip the MXU work too.
    @pl.when(kk < cnt_ref[i])
    def _accumulate():
        acc_ref[...] += jnp.dot(l1_ref[...], xw_ref[...],
                                preferred_element_type=jnp.float32)

    # f32 epilogue on the VPU, exactly once per output row tile.  Fully-zero
    # (padded) row tiles end up as relu(b); the wrapper slices them off.
    @pl.when(kk == pl.num_programs(1) - 1)
    def _finalize():
        o_ref[...] = jnp.maximum(acc_ref[...] + b_ref[...], 0.0).astype(o_ref.dtype)


def gacf_layer(nz_cols, nz_counts, l1_pad, xw, b_pad, *, tm=128, tk=128):
    """relu( L1 @ XW + b ) over a padded (N_pad x N_pad) graph, bf16 output."""
    n_pad = l1_pad.shape[0]
    tp = xw.shape[1]
    ni = n_pad // tm
    max_nnz = nz_cols.shape[0] // ni
    grid = (ni, max_nnz)

    def l1_map(i, kk, cols, cnt):
        return (i, cols[i * max_nnz + kk])

    def xw_map(i, kk, cols, cnt):
        return (cols[i * max_nnz + kk], 0)

    # Explicit scoped-VMEM budget (double-buffered inputs/output + f32 acc),
    # so bigger production tiles don't silently hit the default limit.
    need = 2 * (tm * tk * 2 + tk * tp * 2 + tp * 4 + tm * tp * 2) + tm * tp * 4
    vmem_limit = int(min(64 * 1024 * 1024, max(16 * 1024 * 1024, 3 * need)))

    return pl.pallas_call(
        gacf_layer_kernel,
        out_shape=jax.ShapeDtypeStruct((n_pad, tp), jnp.bfloat16),
        grid_spec=pltpu.PrefetchScalarGridSpec(
            num_scalar_prefetch=2,
            grid=grid,
            in_specs=[
                pl.BlockSpec((tm, tk), l1_map),                     # L1 tile
                pl.BlockSpec((tk, tp), xw_map),                     # XW tile
                pl.BlockSpec((1, tp), lambda i, kk, cols, cnt: (0, 0)),  # bias
            ],
            out_specs=pl.BlockSpec((tm, tp), lambda i, kk, cols, cnt: (i, 0)),
            scratch_shapes=[pltpu.VMEM((tm, tp), jnp.float32)],
        ),
        compiler_params=pltpu.CompilerParams(
            dimension_semantics=("parallel", "arbitrary"),
            vmem_limit_bytes=vmem_limit),
    )(nz_cols, nz_counts, l1_pad, xw, b_pad)


# --------------------------------------------------------------------------- #
# Host-side (NOT jitted): graph structure is fixed, so pad/cast L1 to bf16 and
# build the compacted block-sparse metadata exactly once.
# --------------------------------------------------------------------------- #
def precompute_graph(laplacian, self_loop, *, tm=128, tk=128):
    n = laplacian.shape[0]
    n_pad = _round_up(max(n, 1), tm * tk // math.gcd(tm, tk))
    ni, nk = n_pad // tm, n_pad // tk

    # L1 = laplacianMat + selfLoop, built once, padded & stored bf16 directly
    # (no intermediate padded f32 copy); accumulation stays f32 in-kernel.
    l1_bf16 = (laplacian + self_loop).astype(jnp.bfloat16)
    l1_pad = jnp.zeros((n_pad, n_pad), jnp.bfloat16).at[:n, :n].set(l1_bf16)

    # Per-(row-tile, col-tile) nonzero map, from the bf16 values the MXU sees.
    tile_nz = np.asarray((l1_pad != 0).reshape(ni, tm, nk, tk).any(axis=(1, 3)))
    counts = tile_nz.sum(axis=1).astype(np.int32)
    max_nnz = max(1, int(counts.max()))

    # Compacted nonzero-column list; padding entries repeat the last valid
    # column so the kernel's index_map revisits the same block (DMA skipped).
    cols = np.zeros((ni, max_nnz), dtype=np.int32)
    for r in range(ni):
        idx = np.flatnonzero(tile_nz[r]).astype(np.int32)
        if idx.size:
            cols[r, :idx.size] = idx
            cols[r, idx.size:] = idx[-1]
    return l1_pad, jnp.asarray(cols.reshape(-1)), jnp.asarray(counts)


# --------------------------------------------------------------------------- #
# Forward pass mirroring GACFV2_layer.forward(userIdx, itemIdx, mask).
# --------------------------------------------------------------------------- #
def gacfv2_forward(params, l1_pad, nz_cols, nz_counts, user_idx, item_idx, mask,
                   *, tm=128, tk=128):
    """Note: like the PyTorch module, userIdx/itemIdx do not select rows
    (getFeatureMat always uses ALL user/item embeddings)."""
    del user_idx, item_idx
    # getFeatureMat(): features = cat([userEmbd, itemEmbd], dim=0)
    features = jnp.concatenate([params["uEmbd"], params["iEmbd"]], axis=0)
    n, f0 = features.shape
    n_pad = l1_pad.shape[0]
    final_parts = [features]

    # Row-padded activations at their TRUE feature width (no padded-lane stream).
    x = jnp.zeros((n_pad, f0), features.dtype).at[:n, :].set(features)
    for (w, b) in params["affine"]:
        to, frm = w.shape
        tp = _round_up(to, 128)  # lane-dense output width
        w_t_pad = (jnp.zeros((frm, tp), jnp.float32)
                   .at[:, :to].set(w.T).astype(jnp.bfloat16))
        b_pad = jnp.zeros((1, tp), jnp.float32).at[0, :to].set(b)
        # Hoisted X @ W^T: computed once per layer (small N x F x To matmul in
        # XLA), streamed to the kernel as bf16.
        xw = jnp.dot(x.astype(jnp.bfloat16), w_t_pad,
                     preferred_element_type=jnp.float32).astype(jnp.bfloat16)
        # TODO(synk): ATTLayer_mask is referenced but not defined in the source
        # module; the attention block (and `mask`/droprate) is an identity pass.
        out = gacf_layer(nz_cols, nz_counts, l1_pad, xw, b_pad, tm=tm, tk=tk)
        x = out[:, :to]                                  # bf16, true width only
        final_parts.append(out[:n, :to].astype(jnp.float32))
    return jnp.concatenate(final_parts, axis=1)


# --------------------------------------------------------------------------- #
# Pure-JAX f32 reference matching the PyTorch math.
# --------------------------------------------------------------------------- #
def reference_forward(params, laplacian, self_loop):
    feats = jnp.concatenate([params["uEmbd"], params["iEmbd"]], axis=0)
    l1 = laplacian + self_loop
    final = [feats]
    x = feats
    for (w, b) in params["affine"]:
        x = jnp.maximum(jnp.dot(jnp.dot(l1, x), w.T) + b[None, :], 0.0)
        final.append(x)
    return jnp.concatenate(final, axis=1)


def init_params(key, user_num, item_num, embed_size, layers):
    k_u, k_i, *k_w = jax.random.split(key, 2 + len(layers) - 1)
    params = {
        # nn.init.normal_(std=0.01)
        "uEmbd": 0.01 * jax.random.normal(k_u, (user_num, embed_size), jnp.float32),
        "iEmbd": 0.01 * jax.random.normal(k_i, (item_num, embed_size), jnp.float32),
        "affine": [],
    }
    for kw, (frm, to) in zip(k_w, zip(layers[:-1], layers[1:])):
        # nn.Linear(From, To): weight (To, From) xavier_uniform, bias zeros
        bound = math.sqrt(6.0 / (frm + to))
        w = jax.random.uniform(kw, (to, frm), jnp.float32, -bound, bound)
        b = jnp.zeros((to,), jnp.float32)
        params["affine"].append((w, b))
    return params


def build_adjacency(user_num, item_num):
    """Deterministic dense normalized bipartite adjacency (stand-in for `adj`)."""
    n = user_num + item_num
    rows, cols = [], []
    for u in range(user_num):
        for j in range(3):  # each user interacts with 3 items
            it = (u * 3 + j) % item_num
            rows.append(u)
            cols.append(user_num + it)
            rows.append(user_num + it)
            cols.append(u)
    a = jnp.zeros((n, n), jnp.float32).at[jnp.array(rows), jnp.array(cols)].set(1.0)
    deg = jnp.clip(a.sum(axis=1), 1.0, None)
    d_inv_sqrt = 1.0 / jnp.sqrt(deg)
    laplacian = a * d_inv_sqrt[:, None] * d_inv_sqrt[None, :]
    self_loop = jnp.eye(n, dtype=jnp.float32)  # getSparseEye(userNum + itemNum)
    return laplacian, self_loop


if __name__ == "__main__":
    # N = 400 -> padded to 512 (4x4 tile grid at TM = TK = 128).  Two row tiles
    # have a structurally-zero column tile, so the compacted DMA-skip path and
    # the clamped-padding entries are actually exercised.
    user_num, item_num = 200, 200
    embed_size = 32
    layers = [32, 16, 8]
    n = user_num + item_num

    key = jax.random.PRNGKey(0)
    params = init_params(key, user_num, item_num, embed_size, layers)
    laplacian, self_loop = build_adjacency(user_num, item_num)

    # Graph structure is static -> block-sparse metadata precomputed once, host side.
    l1_pad, nz_cols, nz_counts = precompute_graph(laplacian, self_loop, tm=128, tk=128)

    user_idx = jnp.arange(user_num, dtype=jnp.int32)
    item_idx = jnp.arange(item_num, dtype=jnp.int32)
    mask = jnp.ones((n, n), jnp.float32)  # unused (ATTLayer_mask undefined upstream)

    fwd = jax.jit(functools.partial(gacfv2_forward, tm=128, tk=128))
    out = jax.block_until_ready(
        fwd(params, l1_pad, nz_cols, nz_counts, user_idx, item_idx, mask))

    expected_cols = embed_size + sum(layers[1:])
    assert out.shape == (n, expected_cols), out.shape
    assert out.dtype == jnp.float32
    assert bool(jnp.all(jnp.isfinite(out)))

    # bf16 MXU operands / bf16 output with f32 accumulation -> tolerance-level
    # (not bit-exact) agreement with the f32 reference; values here are O(1e-2).
    ref = reference_forward(params, laplacian, self_loop)
    max_err = float(jnp.max(jnp.abs(out - ref)))
    assert max_err < 1e-2, max_err

    print("KERNEL_OK")
</pallas_src>

<mosaic_0001>
module attributes {stable_mosaic.version = 11 : i64} {
  func.func @gacf_layer_kernel(%arg0: i32, %arg1: i32, %arg2: memref<16xi32, #tpu.memory_space<smem>>, %arg3: memref<4xi32, #tpu.memory_space<smem>>, %arg4: memref<128x128xbf16, #tpu.memory_space<vmem>>, %arg5: memref<128x128xbf16, #tpu.memory_space<vmem>>, %arg6: memref<1x128xf32, #tpu.memory_space<vmem>>, %arg7: memref<128x128xbf16, #tpu.memory_space<vmem>>, %arg8: memref<128x128xf32, #tpu.memory_space<vmem>>) attributes {dimension_semantics = [#tpu.dimension_semantics<parallel>, #tpu.dimension_semantics<arbitrary>], iteration_bounds = array<i64: 4, 4>, scalar_prefetch = 2 : i64, scratch_operands = 1 : i64, tpu.core_type = #tpu.core_type<tc>, window_params = [{transform_indices = @transform_0, window_bounds = array<i64: 128, 128>}, {transform_indices = @transform_1, window_bounds = array<i64: 128, 128>}, {pipeline_mode = #tpu.pipeline_mode<synchronous>, transform_indices = @transform_2, window_bounds = array<i64: 1, 128>}, {transform_indices = @transform_3, window_bounds = array<i64: 128, 128>}]} {
    %c0_i32 = arith.constant 0 : i32
    %0 = arith.cmpi eq, %arg1, %c0_i32 : i32
    %1 = arith.extui %0 : i1 to i32
    %c0_i32_0 = arith.constant 0 : i32
    %2 = arith.cmpi ne, %1, %c0_i32_0 : i32
    scf.if %2 {
      %cst = arith.constant 0.000000e+00 : f32
      %11 = vector.broadcast %cst : f32 to vector<128x128xf32>
      %c0 = arith.constant 0 : index
      %c0_3 = arith.constant 0 : index
      %12 = vector.load %arg8[%c0, %c0_3] : memref<128x128xf32, #tpu.memory_space<vmem>>, vector<128x128xf32>
      tpu.vector_store %arg8[%c0, %c0_3], %11 {strides = array<i32>} : memref<128x128xf32, #tpu.memory_space<vmem>>, vector<128x128xf32>,
    } else {
    }
    %3 = arith.index_cast %arg0 : i32 to index
    %4 = memref.load %arg3[%3] : memref<4xi32, #tpu.memory_space<smem>>
    %5 = arith.cmpi slt, %arg1, %4 : i32
    %6 = arith.extui %5 : i1 to i32
    %c0_i32_1 = arith.constant 0 : i32
    %7 = arith.cmpi ne, %6, %c0_i32_1 : i32
    scf.if %7 {
      %c0 = arith.constant 0 : index
      %c0_3 = arith.constant 0 : index
      %11 = vector.load %arg8[%c0, %c0_3] : memref<128x128xf32, #tpu.memory_space<vmem>>, vector<128x128xf32>
      %c0_4 = arith.constant 0 : index
      %c0_5 = arith.constant 0 : index
      %12 = vector.load %arg4[%c0_4, %c0_5] : memref<128x128xbf16, #tpu.memory_space<vmem>>, vector<128x128xbf16>
      %c0_6 = arith.constant 0 : index
      %c0_7 = arith.constant 0 : index
      %13 = vector.load %arg5[%c0_6, %c0_7] : memref<128x128xbf16, #tpu.memory_space<vmem>>, vector<128x128xbf16>
      %cst = arith.constant dense<0.000000e+00> : vector<128x128xf32>
      %14 = tpu.matmul %12, %13, %cst {dimension_numbers = #tpu.dot_dimension_numbers<[1], [0], [0], [1], [0, 0, 1, 1], [], []>} : vector<128x128xbf16>, vector<128x128xbf16>, vector<128x128xf32> -> vector<128x128xf32>
      %15 = arith.addf %11, %14 : vector<128x128xf32>
      %c0_8 = arith.constant 0 : index
      %c0_9 = arith.constant 0 : index
      %16 = vector.load %arg8[%c0_8, %c0_9] : memref<128x128xf32, #tpu.memory_space<vmem>>, vector<128x128xf32>
      tpu.vector_store %arg8[%c0_8, %c0_9], %15 {strides = array<i32>} : memref<128x128xf32, #tpu.memory_space<vmem>>, vector<128x128xf32>,
    } else {
    }
    %c3_i32 = arith.constant 3 : i32
    %8 = arith.cmpi eq, %arg1, %c3_i32 : i32
    %9 = arith.extui %8 : i1 to i32
    %c0_i32_2 = arith.constant 0 : i32
    %10 = arith.cmpi ne, %9, %c0_i32_2 : i32
    scf.if %10 {
      %c0 = arith.constant 0 : index
      %c0_3 = arith.constant 0 : index
      %11 = vector.load %arg8[%c0, %c0_3] : memref<128x128xf32, #tpu.memory_space<vmem>>, vector<128x128xf32>
      %c0_4 = arith.constant 0 : index
      %c0_5 = arith.constant 0 : index
      %12 = vector.load %arg6[%c0_4, %c0_5] : memref<1x128xf32, #tpu.memory_space<vmem>>, vector<1x128xf32>
      %13 = vector.broadcast %12 : vector<1x128xf32> to vector<128x128xf32>
      %14 = arith.addf %11, %13 : vector<128x128xf32>
      %cst = arith.constant 0.000000e+00 : f32
      %15 = vector.broadcast %cst : f32 to vector<128x128xf32>
      %16 = arith.maximumf %14, %15 : vector<128x128xf32>
      %17 = arith.truncf %16 : vector<128x128xf32> to vector<128x128xbf16>
      %c0_6 = arith.constant 0 : index
      %c0_7 = arith.constant 0 : index
      %18 = vector.load %arg7[%c0_6, %c0_7] : memref<128x128xbf16, #tpu.memory_space<vmem>>, vector<128x128xbf16>
      tpu.vector_store %arg7[%c0_6, %c0_7], %17 {strides = array<i32>} : memref<128x128xbf16, #tpu.memory_space<vmem>>, vector<128x128xbf16>,
    } else {
    }
    return
  }
  func.func @transform_0(%arg0: i32, %arg1: i32, %arg2: memref<16xi32, #tpu.memory_space<smem>>, %arg3: memref<4xi32, #tpu.memory_space<smem>>) -> (i32, i32) {
    %c4_i32 = arith.constant 4 : i32
    %0 = arith.muli %arg0, %c4_i32 : i32
    %1 = arith.addi %0, %arg1 : i32
    %2 = arith.index_cast %1 : i32 to index
    %3 = memref.load %arg2[%2] : memref<16xi32, #tpu.memory_space<smem>>
    %c0_i32 = arith.constant 0 : i32
    return %arg0, %3 : i32, i32
  }
  func.func @transform_1(%arg0: i32, %arg1: i32, %arg2: memref<16xi32, #tpu.memory_space<smem>>, %arg3: memref<4xi32, #tpu.memory_space<smem>>) -> (i32, i32) {
    %c4_i32 = arith.constant 4 : i32
    %0 = arith.muli %arg0, %c4_i32 : i32
    %1 = arith.addi %0, %arg1 : i32
    %2 = arith.index_cast %1 : i32 to index
    %3 = memref.load %arg2[%2] : memref<16xi32, #tpu.memory_space<smem>>
    %c0_i32 = arith.constant 0 : i32
    %c0_i32_0 = arith.constant 0 : i32
    return %3, %c0_i32 : i32, i32
  }
  func.func @transform_2(%arg0: i32, %arg1: i32, %arg2: memref<16xi32, #tpu.memory_space<smem>>, %arg3: memref<4xi32, #tpu.memory_space<smem>>) -> (i32, i32) {
    %c0_i32 = arith.constant 0 : i32
    %c0_i32_0 = arith.constant 0 : i32
    %c0_i32_1 = arith.constant 0 : i32
    return %c0_i32, %c0_i32_0 : i32, i32
  }
  func.func @transform_3(%arg0: i32, %arg1: i32, %arg2: memref<16xi32, #tpu.memory_space<smem>>, %arg3: memref<4xi32, #tpu.memory_space<smem>>) -> (i32, i32) {
    %c0_i32 = arith.constant 0 : i32
    %c0_i32_0 = arith.constant 0 : i32
    return %arg0, %c0_i32 : i32, i32
  }
}

module attributes {stable_mosaic.version = 11 : i64} {
  func.func @gacf_layer_kernel(%arg0: i32, %arg1: i32, %arg2: memref<16xi32, #tpu.memory_space<smem>>, %arg3: memref<4xi32, #tpu.memory_space<smem>>, %arg4: memref<128x128xbf16, #tpu.memory_space<vmem>>, %arg5: memref<128x128xbf16, #tpu.memory_space<vmem>>, %arg6: memref<1x128xf32, #tpu.memory_space<vmem>>, %arg7: memref<128x128xbf16, #tpu.memory_space<vmem>>, %arg8: memref<128x128xf32, #tpu.memory_space<vmem>>) attributes {dimension_semantics = [#tpu.dimension_semantics<parallel>, #tpu.dimension_semantics<arbitrary>], iteration_bounds = array<i64: 4, 4>, scalar_prefetch = 2 : i64, scratch_operands = 1 : i64, tpu.core_type = #tpu.core_type<tc>, window_params = [{transform_indices = @transform_0, window_bounds = array<i64: 128, 128>}, {transform_indices = @transform_1, window_bounds = array<i64: 128, 128>}, {pipeline_mode = #tpu.pipeline_mode<synchronous>, transform_indices = @transform_2, window_bounds = array<i64: 1, 128>}, {transform_indices = @transform_3, window_bounds = array<i64: 128, 128>}]} {
    %c0_i32 = arith.constant 0 : i32
    %0 = arith.cmpi eq, %arg1, %c0_i32 : i32
    %1 = arith.extui %0 : i1 to i32
    %c0_i32_0 = arith.constant 0 : i32
    %2 = arith.cmpi ne, %1, %c0_i32_0 : i32
    scf.if %2 {
      %cst = arith.constant 0.000000e+00 : f32
      %11 = vector.broadcast %cst : f32 to vector<128x128xf32>
      %c0 = arith.constant 0 : index
      %c0_3 = arith.constant 0 : index
      %12 = vector.load %arg8[%c0, %c0_3] : memref<128x128xf32, #tpu.memory_space<vmem>>, vector<128x128xf32>
      tpu.vector_store %arg8[%c0, %c0_3], %11 {strides = array<i32>} : memref<128x128xf32, #tpu.memory_space<vmem>>, vector<128x128xf32>,
    } else {
    }
    %3 = arith.index_cast %arg0 : i32 to index
    %4 = memref.load %arg3[%3] : memref<4xi32, #tpu.memory_space<smem>>
    %5 = arith.cmpi slt, %arg1, %4 : i32
    %6 = arith.extui %5 : i1 to i32
    %c0_i32_1 = arith.constant 0 : i32
    %7 = arith.cmpi ne, %6, %c0_i32_1 : i32
    scf.if %7 {
      %c0 = arith.constant 0 : index
      %c0_3 = arith.constant 0 : index
      %11 = vector.load %arg8[%c0, %c0_3] : memref<128x128xf32, #tpu.memory_space<vmem>>, vector<128x128xf32>
      %c0_4 = arith.constant 0 : index
      %c0_5 = arith.constant 0 : index
      %12 = vector.load %arg4[%c0_4, %c0_5] : memref<128x128xbf16, #tpu.memory_space<vmem>>, vector<128x128xbf16>
      %c0_6 = arith.constant 0 : index
      %c0_7 = arith.constant 0 : index
      %13 = vector.load %arg5[%c0_6, %c0_7] : memref<128x128xbf16, #tpu.memory_space<vmem>>, vector<128x128xbf16>
      %cst = arith.constant dense<0.000000e+00> : vector<128x128xf32>
      %14 = tpu.matmul %12, %13, %cst {dimension_numbers = #tpu.dot_dimension_numbers<[1], [0], [0], [1], [0, 0, 1, 1], [], []>} : vector<128x128xbf16>, vector<128x128xbf16>, vector<128x128xf32> -> vector<128x128xf32>
      %15 = arith.addf %11, %14 : vector<128x128xf32>
      %c0_8 = arith.constant 0 : index
      %c0_9 = arith.constant 0 : index
      %16 = vector.load %arg8[%c0_8, %c0_9] : memref<128x128xf32, #tpu.memory_space<vmem>>, vector<128x128xf32>
      tpu.vector_store %arg8[%c0_8, %c0_9], %15 {strides = array<i32>} : memref<128x128xf32, #tpu.memory_space<vmem>>, vector<128x128xf32>,
    } else {
    }
    %c3_i32 = arith.constant 3 : i32
    %8 = arith.cmpi eq, %arg1, %c3_i32 : i32
    %9 = arith.extui %8 : i1 to i32
    %c0_i32_2 = arith.constant 0 : i32
    %10 = arith.cmpi ne, %9, %c0_i32_2 : i32
    scf.if %10 {
      %c0 = arith.constant 0 : index
      %c0_3 = arith.constant 0 : index
      %11 = vector.load %arg8[%c0, %c0_3] : memref<128x128xf32, #tpu.memory_space<vmem>>, vector<128x128xf32>
      %c0_4 = arith.constant 0 : index
      %c0_5 = arith.constant 0 : index
      %12 = vector.load %arg6[%c0_4, %c0_5] : memref<1x128xf32, #tpu.memory_space<vmem>>, vector<1x128xf32>
      %13 = vector.broadcast %12 : vector<1x128xf32> to vector<128x128xf32>
      %14 = arith.addf %11, %13 : vector<128x128xf32>
      %cst = arith.constant 0.000000e+00 : f32
      %15 = vector.broadcast %cst : f32 to vector<128x128xf32>
      %16 = arith.maximumf %14, %15 : vector<128x128xf32>
      %17 = arith.truncf %16 : vector<128x128xf32> to vector<128x128xbf16>
      %c0_6 = arith.constant 0 : index
      %c0_7 = arith.constant 0 : index
      %18 = vector.load %arg7[%c0_6, %c0_7] : memref<128x128xbf16, #tpu.memory_space<vmem>>, vector<128x128xbf16>
      tpu.vector_store %arg7[%c0_6, %c0_7], %17 {strides = array<i32>} : memref<128x128xbf16, #tpu.memory_space<vmem>>, vector<128x128xbf16>,
    } else {
    }
    return
  }
  func.func @transform_0(%arg0: i32, %arg1: i32, %arg2: memref<16xi32, #tpu.memory_space<smem>>, %arg3: memref<4xi32, #tpu.memory_space<smem>>) -> (i32, i32) {
    %c4_i32 = arith.constant 4 : i32
    %0 = arith.muli %arg0, %c4_i32 : i32
    %1 = arith.addi %0, %arg1 : i32
    %2 = arith.index_cast %1 : i32 to index
    %3 = memref.load %arg2[%2] : memref<16xi32, #tpu.memory_space<smem>>
    %c0_i32 = arith.constant 0 : i32
    return %arg0, %3 : i32, i32
  }
  func.func @transform_1(%arg0: i32, %arg1: i32, %arg2: memref<16xi32, #tpu.memory_space<smem>>, %arg3: memref<4xi32, #tpu.memory_space<smem>>) -> (i32, i32) {
    %c4_i32 = arith.constant 4 : i32
    %0 = arith.muli %arg0, %c4_i32 : i32
    %1 = arith.addi %0, %arg1 : i32
    %2 = arith.index_cast %1 : i32 to index
    %3 = memref.load %arg2[%2] : memref<16xi32, #tpu.memory_space<smem>>
    %c0_i32 = arith.constant 0 : i32
    %c0_i32_0 = arith.constant 0 : i32
    return %3, %c0_i32 : i32, i32
  }
  func.func @transform_2(%arg0: i32, %arg1: i32, %arg2: memref<16xi32, #tpu.memory_space<smem>>, %arg3: memref<4xi32, #tpu.memory_space<smem>>) -> (i32, i32) {
    %c0_i32 = arith.constant 0 : i32
    %c0_i32_0 = arith.constant 0 : i32
    %c0_i32_1 = arith.constant 0 : i32
    return %c0_i32, %c0_i32_0 : i32, i32
  }
  func.func @transform_3(%arg0: i32, %arg1: i32, %arg2: memref<16xi32, #tpu.memory_space<smem>>, %arg3: memref<4xi32, #tpu.memory_space<smem>>) -> (i32, i32) {
    %c0_i32 = arith.constant 0 : i32
    %c0_i32_0 = arith.constant 0 : i32
    return %arg0, %c0_i32 : i32, i32
  }
}

</mosaic_0001>

<bundles_post_ra>
// kernel: gacfv2_forward.2
= control target key start
LH: loop header
LB: loop body
LE: loop exit
PB: predicated region body
PF: predicated region fallthrough
CT: control target
= control target key end

     0   :  { %s1095_s24 = smov [#allocation4]   ;;  %s1096_s25 = smov [#allocation5]   ;;  %s1317_s0 = inlined_call_operand.vmem [shape: s32[16], index: 0, kind: input, shape index: {}]   ;;  %s1318_s2 = inlined_call_operand.hbm [shape: bf16[512,512], index: 2, kind: input, shape index: {}]   ;;  %s1319_s3 = inlined_call_operand.vmem [shape: bf16[512,128], index: 3, kind: input, shape index: {}]   ;;  %s1320_s4 = inlined_call_operand.vmem [shape: f32[1,128], index: 4, kind: input, shape index: {}]   ;;  %s1321_s5 = inlined_call_operand.vmem [shape: bf16[512,128], index: 5, kind: output, shape index: {}]   ;;  %s1322_s1 = inlined_call_operand.vmem [shape: s32[4], index: 1, kind: input, shape index: {}]  }
   0x1   :  { %s11_s20 = sshll.u32 %s1317_s0, 4  ;;  %s16_s23 = sshll.u32 %s1322_s1, 4  ;;  %s12_s20 = int_to_ptr.vmem [resolvable:$true] %s11_s20  ;;  %s17_s23 = int_to_ptr.vmem [resolvable:$true] %s16_s23 }
   0x2   :  { %14 = dma.vmem_to_smem %s12_s20, 16, %s1095_s24, [#allocation3] }
   0x3   :  { %19 = dma.vmem_to_smem %s17_s23, 16, %s1096_s25, [#allocation3] }
   0x4   :  { %1057 = dma.done.wait [#allocation3], 32 }
   0x5   :  { %1058 = vsyncadd [#allocation3], 4294967264 }
   0x6   :  { %22 = sfence }
   0x7   :  { %23 = vsyncpa [#allocation7], 0 }
   0x8   :  { %25 = vsyncpa [#allocation7 + $0x1], 0  ;;  %s1137_s26 = smov 0   ;;  %s1139_s27 = smov 0  }
   0x9   :  { %s1141_s0 = smov 0   ;;  %s1143_s28 = smov 0  }
   0xa   :  { %s1145_s1 = smov 0   ;;  %s1147_s29 = smov 0  }
   0xb   :  { %s1149_s30 = smov 0   ;;  %s1151_s6 = smov 0  }
   0xc LB: > { %s40_s7 = sadd.s32 1, %s1085_s29  ;;  %s43_s8 = sadd.s32 1, %s1089_s30  ;;  %s1093_s6 = sphi %s1151_s6, %s31_s6   ;;  %s1089_s30 = sphi %s1149_s30, %s1337_s30   ;;  %s1085_s29 = sphi %s1147_s29, %s1336_s29   ;;  %s1081_s1 = sphi %s1145_s1, %s1335_s1   ;;  %s1077_s28 = sphi %s1143_s28, %s1334_s28   ;;  %s1073_s0 = sphi %s1141_s0, %s1333_s0   ;;  %s1069_s27 = sphi %s1139_s27, %s1332_s27   ;;  %s1065_s26 = sphi %s1137_s26, %s1331_s26  }
   0xd   : > { %p41_p0 = scmp.ge.s32.totalorder %s40_s7, 4  ;;  %s714_s9 = sshll.u32 %s1089_s30, 2 }
   0xe   : > { %s712_s10 = sadd.s32 4294967295, %s1093_s6   ;;  %s48_s11 = sadd.s32 %s1085_s29, %s714_s9 }
   0xf   : > { %s1339_s7 = smov (%p41_p0, %s40_s7), 0  ;;  %s1341_s8 = smov (!%p41_p0, %s43_s8), %s1089_s30 }
  0x10   : > { %p45_p1 = scmp.ge.s32.totalorder %s1341_s8, 4  ;;  %p65_p2 = scmp.ne.s32.totalorder %s1073_s0, %s1069_s27 }
  0x11   : > { %p66_p3 = scmp.eq.s32.totalorder %s1093_s6, 0  ;;  %p71_p4 = scmp.ne.s32.totalorder %s1069_s27, %s1065_s26 }
  0x12   : > { %s1343_s8 = smov (%p45_p1, %s1341_s8), 0  ;;  %s49_s12 = sld [smem:[#allocation4 + %s48_s11]] }
  0x13   : > { %1324 = sst [smem:[#allocation12_spill]] %s1343_s8  ;;  %p72_p5 = scmp.eq.s32.totalorder %s712_s10, 0 }
  0x14   : > { %s715_s13 = sshll.u32 %s1343_s8, 2  ;;  %p1190_p6 = por %p66_p3, %p65_p2 }
  0x15   : > { %s51_s15 = sadd.s32 %s715_s13, %s1339_s7  ;;  %p1195_p7 = por %p72_p5, %p71_p4 }
  0x16   : > { %s52_s17 = sld [smem:[#allocation4 + %s51_s15]]  ;;  %s53_s18 = ssub.s32 %s1089_s30, %s1343_s8 }
  0x17   : > { %p899_p8 = scmp.lt.s32.totalorder %s1093_s6, 16  ;;  %s177_s19 = sand.u32 1, %s1073_s0  }
  0x18   : > { %s889_s20 = scalar_select %p1190_p6, [#allocation4], [#allocation8] }
  0x19   : > { %s1345_s11 = smov (!%p1190_p6, %s48_s11), 0  ;;  %s58_s22 = sadd.s32 1, %s1073_s0 }
  0x1a   : > { %s720_s24 = sshll.u32 %s177_s19, 6  ;;  %p1210_p10 = pnand %p899_p8, %p1190_p6 }
  0x1b   : > { %s1347_s20 = smov (!%p899_p8, %s889_s20), [#allocation9]  ;;  %s1349_s11 = smov (!%p899_p8, %s1345_s11), 0 }
  0x1c   : > { %s54_s21 = ssub.s32 %s49_s12, %s52_s17  ;;  %s184_s9 = sld [smem:[%s1347_s20 + %s1349_s11]] }
  0x1d   : > { %s55_s23 = sor.u32 %s54_s21, %s53_s18  ;;  %p725_p11 = scmp.ge.s32.totalorder %s1093_s6, 1 }
  0x1e   : > { %p56_p9 = scmp.eq.s32.totalorder %s55_s23, 0  ;;  %s181_s10 = scalar_lea.vmem [#allocation6], %s720_s24 }
  0x1f   : > { %s1218_s13 = sshll.u32 %s181_s10, 4  ;;  %p217_p12 = scmp.lt.s32.totalorder %s1093_s6, 17  ;;  %s195_s13 = int_to_ptr.vmem [resolvable:$true] %s1218_s13 }
  0x20   : > { %s1215_s26 = scalar_select %p56_p9, %s1073_s0, %s58_s22  }
  0x21   : > { %s801_s12 = sshll.u32 %s1089_s30, 6  ;;  %p1222_p13 = pnand %p725_p11, %p217_p12 }
  0x22   : > { %s189_s14 = sadd.s32 %s801_s12, %s184_s9  ;;  %s178_s20 = scalar_lea.sflag [#allocation7], %s177_s19 }
  0x23   : > { %s724_s17 = sshll.u32 %s189_s14, 2  ;;  %p999_p1 = pneg %p1210_p10 }
  0x24   : > { %s191_s22 = scalar_lea.hbm %s1318_s2, %s724_s17  ;;  %s1002_s9 = scalar_lea.hbm %s1318_s2, 1024 }
  0x25   : > { %s192_s11 = sshll.u32 %s191_s22, 4  ;;  %s193_s11 = int_to_ptr.hbm [resolvable:$true] %s192_s11 }
  0x26   : > { %s995_s23 = sshra.s32 %s193_s11, 4  ;;  %s996_s23 = int_to_ptr.hbm [resolvable:$true] %s995_s23 }
  0x27   : > { %s997_s24 = scalar_lea.hbm %s996_s23, 64  ;;  %p1003_p4 = scmp.lt.s32.totalorder %s996_s23, %s1318_s2 }
  0x28   : > { %p998_p0 = scmp.ne.s32.totalorder %s996_s23, %s997_s24  ;;  %p1004_p5 = scmp.lt.s32.totalorder %s1002_s9, %s997_s24 }
  0x2a   : > { %p1000_p2 = pnand %p999_p1, %p998_p0  ;;  %p1005_p6 = por %p1004_p5, %p1003_p4 }
  0x2c   : > { %p1001_p3 = pneg %p1000_p2 }
  0x2e   : > { %p1006_p8 = pnand %p1005_p6, %p1001_p3 }
  0x30   : > { %1009 = shalt.err (!%p1006_p8)
}
  0x31   : > { %s1097_s19 = smov 256   ;;  %s1098_s17 = smov 64  }
  0x32   : > { %s1099_s18 = smov 4   ;;  %221 = sbr.rel (%p1222_p13) target bundleno = 316 (0x13c), region = 32 }
  0x33   : > { %898 = dma.hbm_to_vmem [thread:$0]  (!%p1210_p10), %s193_s11, 1024, %s195_s13, %s178_s20, %s1097_s19, %s1098_s17, %s1099_s18  }
  0x34   : > { %s223_s8 = sand.u32 (!%p1222_p13), 1, %s1069_s27  }
  0x35   : > { %s726_s21 = sshll.u32 (!%p1222_p13), %s223_s8, 6  ;;  %s224_s22 = scalar_lea.sflag (!%p1222_p13), [#allocation7], %s223_s8 }
  0x36   : > { %s1243_s10 = scalar_lea.vmem (!%p1222_p13), [#allocation6], %s726_s21 }
  0x37   : > { %1060 = dma.done.wait (%p1195_p7), %s224_s22, 1024  }
  0x38   : > { %1062 = vsyncadd (%p1195_p7), %s224_s22, 4294966272  ;;  %s727_s25 = sshll.u32 %s1081_s1, 2  ;;  %s730_s13 = sshll.u32 %s1081_s1, 4 }
  0x39   : > { %s264_s11 = sadd.s32 %s1077_s28, %s727_s25  ;;  %p276_p9 = scmp.lt.s32.totalorder %s730_s13, 63 }
  0x3a   : > { %s265_s15 = sld [smem:[#allocation4 + %s264_s11]]  ;;  %p732_p7 = scmp.ne.s32.totalorder %s1077_s28, 0 }
  0x3b   : > { %s1351_s13 = smov (!%p276_p9, %s730_s13), 63 }
  0x3c   : > { %s731_s20 = sshll.u32 %s1351_s13, 2 }
  0x3d   : > { %s1255_s9 = scalar_lea.vmem %s1321_s5, %s731_s20 }
  0x40   : > { %s728_s12 = sshll.u32 %s265_s15, 4 }
  0x41   : > { %p267_p10 = scmp.lt.s32.totalorder %s728_s12, 63  ;;  %284 = sbr.rel (%p732_p7) target bundleno = 87 (0x57), region = 40 }
  0x43   : > { %s1353_s12 = smov (!%p267_p10, %s728_s12), 63 }
  0x44   : > { %s729_s16 = sshll.u32 %s1353_s12, 2 }
  0x45   : > { %s1260_s17 = scalar_lea.vmem %s1319_s3, %s729_s16 }
  0x46   : > { %v1100_v0 = vmov 0.0  }
  0x47   : > { %285 = vst [vmem:[#allocation2 + $0x30] sm:$0xff] %v1100_v0 }
  0x48   : > { %286 = vst [vmem:[#allocation2] sm:$0xff] %v1100_v0 }
  0x49   : > { %287 = vst [vmem:[#allocation2 + $0x58] sm:$0xff] %v1100_v0 }
  0x4a   : > { %288 = vst [vmem:[#allocation2 + $0x18] sm:$0xff] %v1100_v0 }
  0x4b   : > { %289 = vst [vmem:[#allocation2 + $0x50] sm:$0xff] %v1100_v0 }
  0x4c   : > { %290 = vst [vmem:[#allocation2 + $0x68] sm:$0xff] %v1100_v0 }
  0x4d   : > { %291 = vst [vmem:[#allocation2 + $0x8] sm:$0xff] %v1100_v0 }
  0x4e   : > { %292 = vst [vmem:[#allocation2 + $0x48] sm:$0xff] %v1100_v0 }
  0x4f   : > { %293 = vst [vmem:[#allocation2 + $0x40] sm:$0xff] %v1100_v0 }
  0x50   : > { %294 = vst [vmem:[#allocation2 + $0x20] sm:$0xff] %v1100_v0 }
  0x51   : > { %295 = vst [vmem:[#allocation2 + $0x10] sm:$0xff] %v1100_v0 }
  0x52   : > { %296 = vst [vmem:[#allocation2 + $0x38] sm:$0xff] %v1100_v0 }
  0x53   : > { %297 = vst [vmem:[#allocation2 + $0x60] sm:$0xff] %v1100_v0 }
  0x54   : > { %298 = vst [vmem:[#allocation2 + $0x70] sm:$0xff] %v1100_v0 }
  0x55   : > { %299 = vst [vmem:[#allocation2 + $0x78] sm:$0xff] %v1100_v0 }
  0x56   : > { %300 = vst [vmem:[#allocation2 + $0x28] sm:$0xff] %v1100_v0 }
  0x57 PF: > { %s301_s18 = sld [smem:[#allocation5 + %s1081_s1]] }
  0x5d   : > { %p733_p11 = scmp.ge.s32.totalorder %s1077_s28, %s301_s18 }
  0x5f   : > { %305 = sbr.rel (%p733_p11) target bundleno = 293 (0x125), region = 44 }
  0x64   : > { %v817_v1 = vld [vmem:[%s1260_s17 + $0x38] sm:$0xff]  ;;  %v816_v2 = vld [vmem:[%s1260_s17 + $0x30] sm:$0xff]  ;;  %v815_v3 = vld [vmem:[%s1260_s17 + $0x28] sm:$0xff] }
  0x65   : > { %450 = vmatpush.bf16.msra.mxu0 %v817_v1  ;;  %865 = vmatpush.bf16.msra.mxu1 %v817_v1  ;;  %v814_v4 = vld [vmem:[%s1260_s17 + $0x20] sm:$0xff]  ;;  %v813_v5 = vld [vmem:[%s1260_s17 + $0x18] sm:$0xff]  ;;  %v812_v6 = vld [vmem:[%s1260_s17 + $0x10] sm:$0xff] }
  0x66   : > { %866 = vmatpush.bf16.msra.mxu2 %v817_v1  ;;  %867 = vmatpush.bf16.msra.mxu3 %v817_v1  ;;  %v811_v7 = vld [vmem:[%s1260_s17 + $0x8] sm:$0xff]  ;;  %v810_v8 = vld [vmem:[%s1260_s17] sm:$0xff]  ;;  %v804_v10 = vld [vmem:[%s1243_s10 + $0x10] sm:$0xff] }
  0x67   : > { %v802_v9 = vld [vmem:[%s1243_s10] sm:$0xff]  ;;  %v808_v12 = vld [vmem:[%s1243_s10 + $0x30] sm:$0xff]  ;;  %v803_v13 = vld [vmem:[%s1243_s10 + $0x8] sm:$0xff] }
  0x68   : > { %v806_v11 = vld [vmem:[%s1243_s10 + $0x20] sm:$0xff]  ;;  %v805_v14 = vld [vmem:[%s1243_s10 + $0x18] sm:$0xff]  ;;  %v807_v15 = vld [vmem:[%s1243_s10 + $0x28] sm:$0xff] }
  0x69   : > { %451 = vmatpush.bf16.msra.mxu0 %v816_v2  ;;  %868 = vmatpush.bf16.msra.mxu1 %v816_v2  ;;  %v809_v16 = vld [vmem:[%s1243_s10 + $0x38] sm:$0xff]  ;;  %v306_v17 = vld [vmem:[#allocation2 + $0x30] sm:$0xff]  ;;  %v314_v23 = vld [vmem:[#allocation2 + $0x40] sm:$0xff] }
  0x6a   : > { %869 = vmatpush.bf16.msra.mxu2 %v816_v2  ;;  %870 = vmatpush.bf16.msra.mxu3 %v816_v2  ;;  %v310_v18 = vld [vmem:[#allocation2 + $0x50] sm:$0xff]  ;;  %v318_v24 = vld [vmem:[#allocation2 + $0x60] sm:$0xff]  ;;  %v311_v26 = vld [vmem:[#allocation2 + $0x68] sm:$0xff] }
  0x6b   : > { %v307_v25 = vld [vmem:[#allocation2] sm:$0xff]  ;;  %v319_v36 = vld [vmem:[#allocation2 + $0x70] sm:$0xff]  ;;  %v308_v37 = vld [vmem:[#allocation2 + $0x58] sm:$0xff] }
  0x6c   : > { %v315_v35 = vld [vmem:[#allocation2 + $0x20] sm:$0xff]  ;;  %v312_v38 = vld [vmem:[#allocation2 + $0x8] sm:$0xff]  ;;  %v316_v47 = vld [vmem:[#allocation2 + $0x10] sm:$0xff] }
  0x6d   : > { %452 = vmatpush.bf16.msra.mxu0 %v815_v3  ;;  %871 = vmatpush.bf16.msra.mxu1 %v815_v3  ;;  %v320_v48 = vld [vmem:[#allocation2 + $0x78] sm:$0xff]  ;;  %v313_v50 = vld [vmem:[#allocation2 + $0x48] sm:$0xff] }
  0x6e   : > { %872 = vmatpush.bf16.msra.mxu2 %v815_v3  ;;  %873 = vmatpush.bf16.msra.mxu3 %v815_v3  ;;  %v309_v49 = vld [vmem:[#allocation2 + $0x18] sm:$0xff]  ;;  %v321_v60 = vld [vmem:[#allocation2 + $0x28] sm:$0xff] }
  0x6f   : > { %v317_v59 = vld [vmem:[#allocation2 + $0x38] sm:$0xff] }
  0x71   : > { %453 = vmatpush.bf16.msra.mxu0 %v814_v4  ;;  %874 = vmatpush.bf16.msra.mxu1 %v814_v4 }
  0x72   : > { %875 = vmatpush.bf16.msra.mxu2 %v814_v4  ;;  %876 = vmatpush.bf16.msra.mxu3 %v814_v4 }
  0x75   : > { %454 = vmatpush.bf16.msra.mxu0 %v813_v5  ;;  %877 = vmatpush.bf16.msra.mxu1 %v813_v5 }
  0x76   : > { %878 = vmatpush.bf16.msra.mxu2 %v813_v5  ;;  %879 = vmatpush.bf16.msra.mxu3 %v813_v5 }
  0x79   : > { %455 = vmatpush.bf16.msra.mxu0 %v812_v6  ;;  %880 = vmatpush.bf16.msra.mxu1 %v812_v6 }
  0x7a   : > { %881 = vmatpush.bf16.msra.mxu2 %v812_v6  ;;  %882 = vmatpush.bf16.msra.mxu3 %v812_v6 }
  0x7d   : > { %456 = vmatpush.bf16.msra.mxu0 %v811_v7  ;;  %883 = vmatpush.bf16.msra.mxu1 %v811_v7 }
  0x7e   : > { %884 = vmatpush.bf16.msra.mxu2 %v811_v7  ;;  %885 = vmatpush.bf16.msra.mxu3 %v811_v7 }
  0x81   : > { %457 = vmatpush.bf16.msra.mxu0 %v810_v8  ;;  %886 = vmatpush.bf16.msra.mxu1 %v810_v8 }
  0x82   : > { %887 = vmatpush.bf16.msra.mxu2 %v810_v8  ;;  %888 = vmatpush.bf16.msra.mxu3 %v810_v8 }
  0x84   : > { %458 = vmatmul.bf16.vlgmr.msra.gmra.mxu0 %v802_v9  ;;  %468 = vmatmul.bf16.vlgmr.msra.gmra.mxu1 %v804_v10 }
  0x85   : > { %478 = vmatmul.bf16.vlgmr.msra.gmra.mxu2 %v806_v11  ;;  %488 = vmatmul.bf16.vlgmr.msra.gmra.mxu3 %v808_v12 }
  0x94   : > { %463 = vmatmul.bf16.gmra.mxu0 %v803_v13  ;;  %473 = vmatmul.bf16.gmra.mxu1 %v805_v14 }
  0x95   : > { %483 = vmatmul.bf16.gmra.mxu2 %v807_v15  ;;  %493 = vmatmul.bf16.gmra.mxu3 %v809_v16 }
 0x101   : > { %v459_v19 = vpop.f32.mrf.mxu0  ;;  %v469_v20 = vpop.f32.mrf.mxu1 }
 0x102   : > { %v499_v21 = vadd.f32 %v459_v19, %v306_v17  ;;  %v503_v22 = vadd.f32 %v469_v20, %v310_v18 }
 0x104   : > { %515 = vst [vmem:[#allocation2 + $0x30] sm:$0xff] %v499_v21 }
 0x105   : > { %519 = vst [vmem:[#allocation2 + $0x50] sm:$0xff] %v503_v22 }
 0x108   : > { %v479_v27 = vpop.f32.mrf.mxu2  ;;  %v489_v28 = vpop.f32.mrf.mxu3 }
 0x109   : > { %v507_v29 = vadd.f32 %v479_v27, %v314_v23  ;;  %v511_v30 = vadd.f32 %v489_v28, %v318_v24  ;;  %v461_v31 = vpop.f32.mrf.mxu0  ;;  %v471_v32 = vpop.f32.mrf.mxu1 }
 0x10a   : > { %v500_v33 = vadd.f32 %v461_v31, %v307_v25  ;;  %v504_v34 = vadd.f32 %v471_v32, %v311_v26 }
 0x10b   : > { %523 = vst [vmem:[#allocation2 + $0x40] sm:$0xff] %v507_v29 }
 0x10c   : > { %527 = vst [vmem:[#allocation2 + $0x60] sm:$0xff] %v511_v30 }
 0x10d   : > { %516 = vst [vmem:[#allocation2] sm:$0xff] %v500_v33 }
 0x10e   : > { %520 = vst [vmem:[#allocation2 + $0x68] sm:$0xff] %v504_v34 }
 0x110   : > { %v481_v39 = vpop.f32.mrf.mxu2  ;;  %v491_v40 = vpop.f32.mrf.mxu3 }
 0x111   : > { %v508_v41 = vadd.f32 %v481_v39, %v315_v35  ;;  %v512_v42 = vadd.f32 %v491_v40, %v319_v36  ;;  %v464_v43 = vpop.f32.mrf.mxu0  ;;  %v474_v44 = vpop.f32.mrf.mxu1 }
 0x112   : > { %v501_v45 = vadd.f32 %v464_v43, %v308_v37  ;;  %v505_v46 = vadd.f32 %v474_v44, %v312_v38 }
 0x113   : > { %524 = vst [vmem:[#allocation2 + $0x20] sm:$0xff] %v508_v41 }
 0x114   : > { %528 = vst [vmem:[#allocation2 + $0x70] sm:$0xff] %v512_v42 }
 0x115   : > { %517 = vst [vmem:[#allocation2 + $0x58] sm:$0xff] %v501_v45 }
 0x116   : > { %521 = vst [vmem:[#allocation2 + $0x8] sm:$0xff] %v505_v46 }
 0x118   : > { %v484_v51 = vpop.f32.mrf.mxu2  ;;  %v494_v52 = vpop.f32.mrf.mxu3 }
 0x119   : > { %v509_v53 = vadd.f32 %v484_v51, %v316_v47  ;;  %v513_v54 = vadd.f32 %v494_v52, %v320_v48  ;;  %v466_v55 = vpop.f32.mrf.mxu0  ;;  %v476_v56 = vpop.f32.mrf.mxu1 }
 0x11a   : > { %v502_v57 = vadd.f32 %v466_v55, %v309_v49  ;;  %v506_v58 = vadd.f32 %v476_v56, %v313_v50 }
 0x11b   : > { %525 = vst [vmem:[#allocation2 + $0x10] sm:$0xff] %v509_v53 }
 0x11c   : > { %529 = vst [vmem:[#allocation2 + $0x78] sm:$0xff] %v513_v54 }
 0x11d   : > { %518 = vst [vmem:[#allocation2 + $0x18] sm:$0xff] %v502_v57 }
 0x11e   : > { %522 = vst [vmem:[#allocation2 + $0x48] sm:$0xff] %v506_v58 }
 0x120   : > { %v486_v61 = vpop.f32.mrf.mxu2  ;;  %v496_v62 = vpop.f32.mrf.mxu3 }
 0x121   : > { %v510_v63 = vadd.f32 %v486_v61, %v317_v59  ;;  %v514_v0 = vadd.f32 %v496_v62, %v321_v60 }
 0x123   : > { %526 = vst [vmem:[#allocation2 + $0x38] sm:$0xff] %v510_v63 }
 0x124   : > { %530 = vst [vmem:[#allocation2 + $0x28] sm:$0xff] %v514_v0 }
 0x125 PF: > { %p798_p12 = scmp.ne.s32.totalorder %s1077_s28, 3 }
 0x127   : > { %534 = sbr.rel (%p798_p12) target bundleno = 316 (0x13c), region = 48 }
 0x12c   : > { %v535_v1 = vld [vmem:[#allocation2 + $0x30] sm:$0xff]  ;;  %v536_v2 = vld [vmem:[#allocation2] sm:$0xff]  ;;  %v537_v4 = vld [vmem:[#allocation2 + $0x58] sm:$0xff] }
 0x12d   : > { %v970_v3 = vld [vmem:[%s1320_s4] ss:$0 sm:$0xff]  ;;  %v538_v5 = vld [vmem:[#allocation2 + $0x18] sm:$0xff]  ;;  %v539_v6 = vld [vmem:[#allocation2 + $0x50] sm:$0xff] }
 0x12e   : > { %v540_v7 = vld [vmem:[#allocation2 + $0x68] sm:$0xff]  ;;  %v555_v9 = vadd.f32 %v970_v3, %v535_v1  ;;  %v556_v10 = vadd.f32 %v970_v3, %v536_v2  ;;  %v557_v11 = vadd.f32 %v970_v3, %v537_v4  ;;  %v558_v12 = vadd.f32 %v970_v3, %v538_v5  ;;  %v543_v18 = vld [vmem:[#allocation2 + $0x40] sm:$0xff]  ;;  %v545_v24 = vld [vmem:[#allocation2 + $0x10] sm:$0xff] }
 0x12f   : > { %v541_v8 = vld [vmem:[#allocation2 + $0x8] sm:$0xff]  ;;  %v559_v14 = vadd.f32 %v970_v3, %v539_v6  ;;  %v560_v15 = vadd.f32 %v970_v3, %v540_v7  ;;  %v544_v19 = vld [vmem:[#allocation2 + $0x20] sm:$0xff]  ;;  %v546_v25 = vld [vmem:[#allocation2 + $0x38] sm:$0xff]  ;;  %v563_v34 = vadd.f32 %v970_v3, %v543_v18  ;;  %v565_v40 = vadd.f32 %v970_v3, %v545_v24 }
 0x130   : > { %v542_v13 = vld [vmem:[#allocation2 + $0x48] sm:$0xff]  ;;  %v561_v16 = vadd.f32 %v970_v3, %v541_v8  ;;  %v571_v20 = vmax.f32 %v555_v9, 0.0  ;;  %v572_v21 = vmax.f32 %v556_v10, 0.0  ;;  %v573_v22 = vmax.f32 %v557_v11, 0.0  ;;  %v547_v30 = vld [vmem:[#allocation2 + $0x60] sm:$0xff]  ;;  %v548_v31 = vld [vmem:[#allocation2 + $0x70] sm:$0xff] }
 0x131   : > { %v562_v17 = vadd.f32 %v970_v3, %v542_v13  ;;  %v574_v23 = vmax.f32 %v558_v12, 0.0  ;;  %v575_v26 = vmax.f32 %v559_v14, 0.0  ;;  %v576_v27 = vmax.f32 %v560_v15, 0.0  ;;  %v549_v36 = vld [vmem:[#allocation2 + $0x78] sm:$0xff]  ;;  %v550_v37 = vld [vmem:[#allocation2 + $0x28] sm:$0xff] }
 0x132   : > { %v577_v28 = vmax.f32 %v561_v16, 0.0  ;;  %v821_v32 = vpack.c.bf16 %v572_v21, %v571_v20  ;;  %v564_v35 = vadd.f32 %v970_v3, %v544_v19  ;;  %v566_v41 = vadd.f32 %v970_v3, %v546_v25 }
 0x133   : > { %v578_v29 = vmax.f32 %v562_v17, 0.0  ;;  %v826_v33 = vpack.c.bf16 %v574_v23, %v573_v22  ;;  %v831_v38 = vpack.c.bf16 %v576_v27, %v575_v26  ;;  %v579_v42 = vmax.f32 %v563_v34, 0.0 }
 0x134   : > { %822 = vst [vmem:[%s1255_s9] sm:$0xff] %v821_v32   ;;  %v580_v43 = vmax.f32 %v564_v35, 0.0  ;;  %v567_v44 = vadd.f32 %v970_v3, %v547_v30  ;;  %v568_v45 = vadd.f32 %v970_v3, %v548_v31  ;;  %v581_v46 = vmax.f32 %v565_v40, 0.0 }
 0x135   : > { %v836_v39 = vpack.c.bf16 %v578_v29, %v577_v28  ;;  %858 = vst [vmem:[%s1255_s9 + $0x8] sm:$0xff] %v826_v33   ;;  %v582_v47 = vmax.f32 %v566_v41, 0.0  ;;  %v569_v48 = vadd.f32 %v970_v3, %v549_v36  ;;  %v570_v49 = vadd.f32 %v970_v3, %v550_v37 }
 0x136   : > { %859 = vst [vmem:[%s1255_s9 + $0x10] sm:$0xff] %v831_v38   ;;  %v841_v50 = vpack.c.bf16 %v580_v43, %v579_v42  ;;  %v583_v51 = vmax.f32 %v567_v44, 0.0  ;;  %v584_v52 = vmax.f32 %v568_v45, 0.0 }
 0x137   : > { %860 = vst [vmem:[%s1255_s9 + $0x18] sm:$0xff] %v836_v39   ;;  %v846_v53 = vpack.c.bf16 %v582_v47, %v581_v46  ;;  %v585_v54 = vmax.f32 %v569_v48, 0.0  ;;  %v586_v55 = vmax.f32 %v570_v49, 0.0 }
 0x138   : > { %861 = vst [vmem:[%s1255_s9 + $0x20] sm:$0xff] %v841_v50   ;;  %v851_v56 = vpack.c.bf16 %v584_v52, %v583_v51 }
 0x139   : > { %862 = vst [vmem:[%s1255_s9 + $0x28] sm:$0xff] %v846_v53   ;;  %v856_v57 = vpack.c.bf16 %v586_v55, %v585_v54 }
 0x13a   : > { %863 = vst [vmem:[%s1255_s9 + $0x30] sm:$0xff] %v851_v56  }
 0x13b   : > { %864 = vst [vmem:[%s1255_s9 + $0x38] sm:$0xff] %v856_v57  }
 0x13c PF: > { %s31_s6 = sadd.s32 1, %s1093_s6   ;;  %s1329_s28 = smov %s1215_s26 }
 0x13d   : > { %p28_p13 = scmp.ge.s32.totalorder %s31_s6, 18   ;;  %s1330_s21 = sld [smem:[#allocation12_spill]] }
 0x13e   : > { %s1331_s26 = smov %s1069_s27  ;;  %s1332_s27 = smov %s1073_s0 }
 0x13f   : > { %s1333_s0 = smov %s1329_s28  ;;  %s1334_s28 = smov %s1085_s29 }
 0x140   : > { %s1335_s1 = smov %s1089_s30  ;;  %s1336_s29 = smov %s1339_s7 }
 0x141   :  { %30 = sbr.rel (!%p28_p13) target bundleno = 12 (0xc), region = 87 }
 0x143   : > { %s1337_s30 = smov %s1330_s21 }
 0x146   :  { %641 = vsyncpa [#allocation7], 1 }
 0x147   :  { %643 = vsyncpa [#allocation7 + $0x1], 1 }

// kernel: gacfv2_forward.3
= control target key start
LH: loop header
LB: loop body
LE: loop exit
PB: predicated region body
PF: predicated region fallthrough
CT: control target
= control target key end

     0   :  { %s1108_s24 = smov [#allocation4]   ;;  %s1109_s25 = smov [#allocation5]   ;;  %s1296_s0 = inlined_call_operand.vmem [shape: s32[16], index: 0, kind: input, shape index: {}]   ;;  %s1297_s2 = inlined_call_operand.vmem [shape: bf16[512,512], index: 2, kind: input, shape index: {}]   ;;  %s1298_s3 = inlined_call_operand.vmem [shape: bf16[512,128], index: 3, kind: input, shape index: {}]   ;;  %s1299_s4 = inlined_call_operand.vmem [shape: f32[1,128], index: 4, kind: input, shape index: {}]   ;;  %s1300_s5 = inlined_call_operand.vmem [shape: bf16[512,128], index: 5, kind: output, shape index: {}]   ;;  %s1301_s1 = inlined_call_operand.vmem [shape: s32[4], index: 1, kind: input, shape index: {}]  }
   0x1   :  { %s11_s20 = sshll.u32 %s1296_s0, 4  ;;  %s16_s23 = sshll.u32 %s1301_s1, 4  ;;  %s12_s20 = int_to_ptr.vmem [resolvable:$true] %s11_s20  ;;  %s17_s23 = int_to_ptr.vmem [resolvable:$true] %s16_s23 }
   0x2   :  { %14 = dma.vmem_to_smem %s12_s20, 16, %s1108_s24, [#allocation3] }
   0x3   :  { %19 = dma.vmem_to_smem %s17_s23, 16, %s1109_s25, [#allocation3] }
   0x4   :  { %1078 = dma.done.wait [#allocation3], 32 }
   0x5   :  { %1079 = vsyncadd [#allocation3], 4294967264 }
   0x6   :  { %22 = sfence }
   0x7   :  { %s1147_s26 = smov 0   ;;  %s1149_s27 = smov 0  }
   0x8   :  { %s1151_s28 = smov 0   ;;  %s1153_s0 = smov 0  }
   0x9   :  { %s1155_s29 = smov 0   ;;  %s1157_s1 = smov 0  }
   0xa   :  { %s1159_s30 = smov 0  }
   0xb LB: > { %s37_s6 = sadd.s32 1, %s1098_s29  ;;  %s40_s7 = sadd.s32 1, %s1102_s1  ;;  %s1106_s30 = sphi %s1159_s30, %s28_s30   ;;  %s1102_s1 = sphi %s1157_s1, %s1307_s1   ;;  %s1098_s29 = sphi %s1155_s29, %s1306_s29   ;;  %s1094_s0 = sphi %s1153_s0, %s1305_s0   ;;  %s1090_s28 = sphi %s1151_s28, %s1304_s28   ;;  %s1086_s27 = sphi %s1149_s27, %s1303_s27   ;;  %s1082_s26 = sphi %s1147_s26, %s1302_s26  }
   0xc   : > { %p38_p0 = scmp.ge.s32.totalorder %s37_s6, 4  ;;  %s791_s8 = sshll.u32 %s1102_s1, 2 }
   0xd   : > { %s45_s9 = sadd.s32 %s1098_s29, %s791_s8  ;;  %p62_p1 = scmp.ne.s32.totalorder %s1086_s27, %s1082_s26 }
   0xe   : > { %s1309_s7 = smov (!%p38_p0, %s40_s7), %s1102_s1  ;;  %p63_p3 = scmp.eq.s32.totalorder %s1106_s30, 0 }
   0xf   : > { %p42_p2 = scmp.ge.s32.totalorder %s1309_s7, 4  ;;  %s1311_s6 = smov (%p38_p0, %s37_s6), 0 }
  0x10   : > { %p64_p4 = por %p63_p3, %p62_p1  ;;  %s46_s10 = sld [smem:[#allocation4 + %s45_s9]] }
  0x11   : > { %s1313_s7 = smov (%p42_p2, %s1309_s7), 0  ;;  %s55_s17 = sadd.s32 1, %s1086_s27 }
  0x12   : > { %s792_s11 = sshll.u32 %s1313_s7, 2  ;;  %s50_s14 = ssub.s32 %s1102_s1, %s1313_s7 }
  0x13   : > { %s48_s12 = sadd.s32 %s792_s11, %s1311_s6  ;;  %p796_p6 = scmp.ge.s32.totalorder %s1106_s30, 16 }
  0x14   : > { %s49_s13 = sld [smem:[#allocation4 + %s48_s12]] }
  0x1a   : > { %s51_s15 = ssub.s32 %s46_s10, %s49_s13  ;;  %170 = sbr.rel (%p796_p6) target bundleno = 57 (0x39), region = 20 }
  0x1b   : > { %s52_s16 = sor.u32 %s51_s15, %s50_s14 }
  0x1c   : > { %p53_p5 = scmp.eq.s32.totalorder %s52_s16, 0 }
  0x1e   : > { %s1200_s18 = scalar_select %p53_p5, %s1086_s27, %s55_s17  }
  0x1f   : > { %173 = sbr.rel (!%p64_p4) target bundleno = 57 (0x39), region = 24  ;;  %s180_s19 = sld [smem:[#allocation4 + %s45_s9]] (%p64_p4) }
  0x20   : > { %s175_s20 = sand.u32 (%p64_p4), 1, %s1086_s27   ;;  %s878_s21 = sshll.u32 (%p64_p4), %s1102_s1, 6 }
  0x21   : > { %s797_s22 = sshll.u32 (%p64_p4), %s175_s20, 6 }
  0x22   : > { %s177_s9 = scalar_lea.vmem (%p64_p4), [#allocation6], %s797_s22 }
  0x25   : > { %s183_s23 = sadd.s32 %s878_s21, %s180_s19 }
  0x26   : > { %s801_s24 = sshll.u32 %s183_s23, 2 }
  0x27   : > { %s1208_s10 = scalar_lea.vmem %s1297_s2, %s801_s24 }
  0x28   : > { %v202_v0 = vld [vmem:[%s1208_s10] sm:$0xf]  ;;  %v204_v1 = vld [vmem:[%s1208_s10 + $0x10] sm:$0xf] }
  0x29   : > { %v206_v2 = vld [vmem:[%s1208_s10 + $0x20] sm:$0xf]  ;;  %203 = vst [vmem:[%s177_s9] sm:$0xf] %v202_v0  ;;  %v208_v3 = vld [vmem:[%s1208_s10 + $0x30] sm:$0xf] }
  0x2a   : > { %205 = vst [vmem:[%s177_s9 + $0x4] sm:$0xf] %v204_v1  ;;  %v210_v4 = vld [vmem:[%s1208_s10 + $0x40] sm:$0xf]  ;;  %v212_v5 = vld [vmem:[%s1208_s10 + $0x50] sm:$0xf] }
  0x2b   : > { %207 = vst [vmem:[%s177_s9 + $0x8] sm:$0xf] %v206_v2  ;;  %v214_v6 = vld [vmem:[%s1208_s10 + $0x60] sm:$0xf]  ;;  %v216_v7 = vld [vmem:[%s1208_s10 + $0x70] sm:$0xf] }
  0x2c   : > { %209 = vst [vmem:[%s177_s9 + $0xc] sm:$0xf] %v208_v3  ;;  %v218_v8 = vld [vmem:[%s1208_s10 + $0x80] sm:$0xf]  ;;  %v220_v9 = vld [vmem:[%s1208_s10 + $0x90] sm:$0xf] }
  0x2d   : > { %211 = vst [vmem:[%s177_s9 + $0x10] sm:$0xf] %v210_v4  ;;  %v222_v10 = vld [vmem:[%s1208_s10 + $0xa0] sm:$0xf]  ;;  %v224_v11 = vld [vmem:[%s1208_s10 + $0xb0] sm:$0xf] }
  0x2e   : > { %213 = vst [vmem:[%s177_s9 + $0x14] sm:$0xf] %v212_v5  ;;  %v226_v12 = vld [vmem:[%s1208_s10 + $0xc0] sm:$0xf]  ;;  %v228_v13 = vld [vmem:[%s1208_s10 + $0xd0] sm:$0xf] }
  0x2f   : > { %215 = vst [vmem:[%s177_s9 + $0x18] sm:$0xf] %v214_v6  ;;  %v230_v14 = vld [vmem:[%s1208_s10 + $0xe0] sm:$0xf]  ;;  %v232_v15 = vld [vmem:[%s1208_s10 + $0xf0] sm:$0xf] }
  0x30   : > { %217 = vst [vmem:[%s177_s9 + $0x1c] sm:$0xf] %v216_v7 }
  0x31   : > { %219 = vst [vmem:[%s177_s9 + $0x20] sm:$0xf] %v218_v8 }
  0x32   : > { %221 = vst [vmem:[%s177_s9 + $0x24] sm:$0xf] %v220_v9 }
  0x33   : > { %223 = vst [vmem:[%s177_s9 + $0x28] sm:$0xf] %v222_v10 }
  0x34   : > { %225 = vst [vmem:[%s177_s9 + $0x2c] sm:$0xf] %v224_v11 }
  0x35   : > { %227 = vst [vmem:[%s177_s9 + $0x30] sm:$0xf] %v226_v12 }
  0x36   : > { %229 = vst [vmem:[%s177_s9 + $0x34] sm:$0xf] %v228_v13 }
  0x37   : > { %231 = vst [vmem:[%s177_s9 + $0x38] sm:$0xf] %v230_v14 }
  0x38   : > { %233 = vst [vmem:[%s177_s9 + $0x3c] sm:$0xf] %v232_v15 }
  0x39 PF: > { %p802_p7 = scmp.ge.s32.totalorder %s1106_s30, 1  ;;  %p303_p8 = scmp.lt.s32.totalorder %s1106_s30, 17 }
  0x3b   : > { %p304_p9 = pnand %p802_p7, %p303_p8 }
  0x3c   : > { %s310_s11 = sand.u32 (!%p304_p9), 1, %s1082_s26   ;;  %s804_s12 = sshll.u32 (!%p304_p9), %s1094_s0, 2 }
  0x3d   : > { %307 = sbr.rel (%p304_p9) target bundleno = 321 (0x141), region = 69  ;;  %s803_s13 = sshll.u32 (!%p304_p9), %s310_s11, 6 }
  0x3e   : > { %s346_s14 = sadd.s32 (!%p304_p9), %s1090_s28, %s804_s12  ;;  %s807_s16 = sshll.u32 (!%p304_p9), %s1094_s0, 4 }
  0x3f   : > { %s347_s15 = sld [smem:[#allocation4 + %s346_s14]] (!%p304_p9)  ;;  %p358_p10 = scmp.lt.s32.totalorder (!%p304_p9), %s807_s16, 63 }
  0x40   : > { %s1242_s8 = scalar_lea.vmem (!%p304_p9), [#allocation6], %s803_s13  ;;  %p809_p12 = scmp.ne.s32.totalorder (!%p304_p9), %s1090_s28, 0 }
  0x42   : > { %s1315_s16 = smov (!%p358_p10, %s807_s16), 63 }
  0x43   : > { %s808_s19 = sshll.u32 %s1315_s16, 2 }
  0x44   : > { %s1235_s22 = scalar_lea.vmem %s1300_s5, %s808_s19 }
  0x45   : > { %s805_s17 = sshll.u32 %s347_s15, 4 }
  0x46   : > { %p349_p11 = scmp.lt.s32.totalorder %s805_s17, 63  ;;  %366 = sbr.rel (%p809_p12) target bundleno = 92 (0x5c), region = 77 }
  0x48   : > { %s1317_s17 = smov (!%p349_p11, %s805_s17), 63 }
  0x49   : > { %s806_s23 = sshll.u32 %s1317_s17, 2 }
  0x4a   : > { %s1240_s26 = scalar_lea.vmem %s1298_s3, %s806_s23 }
  0x4b   : > { %v1110_v16 = vmov 0.0  }
  0x4c   : > { %367 = vst [vmem:[#allocation2 + $0x30] sm:$0xff] %v1110_v16 }
  0x4d   : > { %368 = vst [vmem:[#allocation2] sm:$0xff] %v1110_v16 }
  0x4e   : > { %369 = vst [vmem:[#allocation2 + $0x58] sm:$0xff] %v1110_v16 }
  0x4f   : > { %370 = vst [vmem:[#allocation2 + $0x18] sm:$0xff] %v1110_v16 }
  0x50   : > { %371 = vst [vmem:[#allocation2 + $0x50] sm:$0xff] %v1110_v16 }
  0x51   : > { %372 = vst [vmem:[#allocation2 + $0x68] sm:$0xff] %v1110_v16 }
  0x52   : > { %373 = vst [vmem:[#allocation2 + $0x8] sm:$0xff] %v1110_v16 }
  0x53   : > { %374 = vst [vmem:[#allocation2 + $0x48] sm:$0xff] %v1110_v16 }
  0x54   : > { %375 = vst [vmem:[#allocation2 + $0x40] sm:$0xff] %v1110_v16 }
  0x55   : > { %376 = vst [vmem:[#allocation2 + $0x20] sm:$0xff] %v1110_v16 }
  0x56   : > { %377 = vst [vmem:[#allocation2 + $0x10] sm:$0xff] %v1110_v16 }
  0x57   : > { %378 = vst [vmem:[#allocation2 + $0x38] sm:$0xff] %v1110_v16 }
  0x58   : > { %379 = vst [vmem:[#allocation2 + $0x60] sm:$0xff] %v1110_v16 }
  0x59   : > { %380 = vst [vmem:[#allocation2 + $0x70] sm:$0xff] %v1110_v16 }
  0x5a   : > { %381 = vst [vmem:[#allocation2 + $0x78] sm:$0xff] %v1110_v16 }
  0x5b   : > { %382 = vst [vmem:[#allocation2 + $0x28] sm:$0xff] %v1110_v16 }
  0x5c PF: > { %s383_s10 = sld [smem:[#allocation5 + %s1094_s0]] }
  0x62   : > { %p810_p13 = scmp.ge.s32.totalorder %s1090_s28, %s383_s10 }
  0x64   : > { %387 = sbr.rel (%p810_p13) target bundleno = 298 (0x12a), region = 81 }
  0x69   : > { %v894_v17 = vld [vmem:[%s1240_s26 + $0x38] sm:$0xff]  ;;  %v893_v18 = vld [vmem:[%s1240_s26 + $0x30] sm:$0xff]  ;;  %v892_v19 = vld [vmem:[%s1240_s26 + $0x28] sm:$0xff] }
  0x6a   : > { %532 = vmatpush.bf16.msra.mxu0 %v894_v17  ;;  %942 = vmatpush.bf16.msra.mxu1 %v894_v17  ;;  %v891_v20 = vld [vmem:[%s1240_s26 + $0x20] sm:$0xff]  ;;  %v890_v21 = vld [vmem:[%s1240_s26 + $0x18] sm:$0xff]  ;;  %v889_v22 = vld [vmem:[%s1240_s26 + $0x10] sm:$0xff] }
  0x6b   : > { %943 = vmatpush.bf16.msra.mxu2 %v894_v17  ;;  %944 = vmatpush.bf16.msra.mxu3 %v894_v17  ;;  %v888_v23 = vld [vmem:[%s1240_s26 + $0x8] sm:$0xff]  ;;  %v887_v24 = vld [vmem:[%s1240_s26] sm:$0xff]  ;;  %v881_v26 = vld [vmem:[%s1242_s8 + $0x10] sm:$0xff] }
  0x6c   : > { %v879_v25 = vld [vmem:[%s1242_s8] sm:$0xff]  ;;  %v885_v28 = vld [vmem:[%s1242_s8 + $0x30] sm:$0xff]  ;;  %v880_v29 = vld [vmem:[%s1242_s8 + $0x8] sm:$0xff] }
  0x6d   : > { %v883_v27 = vld [vmem:[%s1242_s8 + $0x20] sm:$0xff]  ;;  %v882_v30 = vld [vmem:[%s1242_s8 + $0x18] sm:$0xff]  ;;  %v884_v31 = vld [vmem:[%s1242_s8 + $0x28] sm:$0xff] }
  0x6e   : > { %533 = vmatpush.bf16.msra.mxu0 %v893_v18  ;;  %945 = vmatpush.bf16.msra.mxu1 %v893_v18  ;;  %v886_v32 = vld [vmem:[%s1242_s8 + $0x38] sm:$0xff]  ;;  %v388_v33 = vld [vmem:[#allocation2 + $0x30] sm:$0xff]  ;;  %v396_v39 = vld [vmem:[#allocation2 + $0x40] sm:$0xff] }
  0x6f   : > { %946 = vmatpush.bf16.msra.mxu2 %v893_v18  ;;  %947 = vmatpush.bf16.msra.mxu3 %v893_v18  ;;  %v392_v34 = vld [vmem:[#allocation2 + $0x50] sm:$0xff]  ;;  %v400_v40 = vld [vmem:[#allocation2 + $0x60] sm:$0xff]  ;;  %v393_v42 = vld [vmem:[#allocation2 + $0x68] sm:$0xff] }
  0x70   : > { %v389_v41 = vld [vmem:[#allocation2] sm:$0xff]  ;;  %v401_v52 = vld [vmem:[#allocation2 + $0x70] sm:$0xff]  ;;  %v390_v53 = vld [vmem:[#allocation2 + $0x58] sm:$0xff] }
  0x71   : > { %v397_v51 = vld [vmem:[#allocation2 + $0x20] sm:$0xff]  ;;  %v394_v54 = vld [vmem:[#allocation2 + $0x8] sm:$0xff]  ;;  %v398_v63 = vld [vmem:[#allocation2 + $0x10] sm:$0xff] }
  0x72   : > { %534 = vmatpush.bf16.msra.mxu0 %v892_v19  ;;  %948 = vmatpush.bf16.msra.mxu1 %v892_v19  ;;  %v402_v0 = vld [vmem:[#allocation2 + $0x78] sm:$0xff]  ;;  %v395_v2 = vld [vmem:[#allocation2 + $0x48] sm:$0xff] }
  0x73   : > { %949 = vmatpush.bf16.msra.mxu2 %v892_v19  ;;  %950 = vmatpush.bf16.msra.mxu3 %v892_v19  ;;  %v391_v1 = vld [vmem:[#allocation2 + $0x18] sm:$0xff]  ;;  %v403_v12 = vld [vmem:[#allocation2 + $0x28] sm:$0xff] }
  0x74   : > { %v399_v11 = vld [vmem:[#allocation2 + $0x38] sm:$0xff] }
  0x76   : > { %535 = vmatpush.bf16.msra.mxu0 %v891_v20  ;;  %951 = vmatpush.bf16.msra.mxu1 %v891_v20 }
  0x77   : > { %952 = vmatpush.bf16.msra.mxu2 %v891_v20  ;;  %953 = vmatpush.bf16.msra.mxu3 %v891_v20 }
  0x7a   : > { %536 = vmatpush.bf16.msra.mxu0 %v890_v21  ;;  %954 = vmatpush.bf16.msra.mxu1 %v890_v21 }
  0x7b   : > { %955 = vmatpush.bf16.msra.mxu2 %v890_v21  ;;  %956 = vmatpush.bf16.msra.mxu3 %v890_v21 }
  0x7e   : > { %537 = vmatpush.bf16.msra.mxu0 %v889_v22  ;;  %957 = vmatpush.bf16.msra.mxu1 %v889_v22 }
  0x7f   : > { %958 = vmatpush.bf16.msra.mxu2 %v889_v22  ;;  %959 = vmatpush.bf16.msra.mxu3 %v889_v22 }
  0x82   : > { %538 = vmatpush.bf16.msra.mxu0 %v888_v23  ;;  %960 = vmatpush.bf16.msra.mxu1 %v888_v23 }
  0x83   : > { %961 = vmatpush.bf16.msra.mxu2 %v888_v23  ;;  %962 = vmatpush.bf16.msra.mxu3 %v888_v23 }
  0x86   : > { %539 = vmatpush.bf16.msra.mxu0 %v887_v24  ;;  %963 = vmatpush.bf16.msra.mxu1 %v887_v24 }
  0x87   : > { %964 = vmatpush.bf16.msra.mxu2 %v887_v24  ;;  %965 = vmatpush.bf16.msra.mxu3 %v887_v24 }
  0x89   : > { %540 = vmatmul.bf16.vlgmr.msra.gmra.mxu0 %v879_v25  ;;  %550 = vmatmul.bf16.vlgmr.msra.gmra.mxu1 %v881_v26 }
  0x8a   : > { %560 = vmatmul.bf16.vlgmr.msra.gmra.mxu2 %v883_v27  ;;  %570 = vmatmul.bf16.vlgmr.msra.gmra.mxu3 %v885_v28 }
  0x99   : > { %545 = vmatmul.bf16.gmra.mxu0 %v880_v29  ;;  %555 = vmatmul.bf16.gmra.mxu1 %v882_v30 }
  0x9a   : > { %565 = vmatmul.bf16.gmra.mxu2 %v884_v31  ;;  %575 = vmatmul.bf16.gmra.mxu3 %v886_v32 }
 0x106   : > { %v541_v35 = vpop.f32.mrf.mxu0  ;;  %v551_v36 = vpop.f32.mrf.mxu1 }
 0x107   : > { %v581_v37 = vadd.f32 %v541_v35, %v388_v33  ;;  %v585_v38 = vadd.f32 %v551_v36, %v392_v34 }
 0x109   : > { %597 = vst [vmem:[#allocation2 + $0x30] sm:$0xff] %v581_v37 }
 0x10a   : > { %601 = vst [vmem:[#allocation2 + $0x50] sm:$0xff] %v585_v38 }
 0x10d   : > { %v561_v43 = vpop.f32.mrf.mxu2  ;;  %v571_v44 = vpop.f32.mrf.mxu3 }
 0x10e   : > { %v589_v45 = vadd.f32 %v561_v43, %v396_v39  ;;  %v593_v46 = vadd.f32 %v571_v44, %v400_v40  ;;  %v543_v47 = vpop.f32.mrf.mxu0  ;;  %v553_v48 = vpop.f32.mrf.mxu1 }
 0x10f   : > { %v582_v49 = vadd.f32 %v543_v47, %v389_v41  ;;  %v586_v50 = vadd.f32 %v553_v48, %v393_v42 }
 0x110   : > { %605 = vst [vmem:[#allocation2 + $0x40] sm:$0xff] %v589_v45 }
 0x111   : > { %609 = vst [vmem:[#allocation2 + $0x60] sm:$0xff] %v593_v46 }
 0x112   : > { %598 = vst [vmem:[#allocation2] sm:$0xff] %v582_v49 }
 0x113   : > { %602 = vst [vmem:[#allocation2 + $0x68] sm:$0xff] %v586_v50 }
 0x115   : > { %v563_v55 = vpop.f32.mrf.mxu2  ;;  %v573_v56 = vpop.f32.mrf.mxu3 }
 0x116   : > { %v590_v57 = vadd.f32 %v563_v55, %v397_v51  ;;  %v594_v58 = vadd.f32 %v573_v56, %v401_v52  ;;  %v546_v59 = vpop.f32.mrf.mxu0  ;;  %v556_v60 = vpop.f32.mrf.mxu1 }
 0x117   : > { %v583_v61 = vadd.f32 %v546_v59, %v390_v53  ;;  %v587_v62 = vadd.f32 %v556_v60, %v394_v54 }
 0x118   : > { %606 = vst [vmem:[#allocation2 + $0x20] sm:$0xff] %v590_v57 }
 0x119   : > { %610 = vst [vmem:[#allocation2 + $0x70] sm:$0xff] %v594_v58 }
 0x11a   : > { %599 = vst [vmem:[#allocation2 + $0x58] sm:$0xff] %v583_v61 }
 0x11b   : > { %603 = vst [vmem:[#allocation2 + $0x8] sm:$0xff] %v587_v62 }
 0x11d   : > { %v566_v3 = vpop.f32.mrf.mxu2  ;;  %v576_v4 = vpop.f32.mrf.mxu3 }
 0x11e   : > { %v591_v5 = vadd.f32 %v566_v3, %v398_v63  ;;  %v595_v6 = vadd.f32 %v576_v4, %v402_v0  ;;  %v548_v7 = vpop.f32.mrf.mxu0  ;;  %v558_v8 = vpop.f32.mrf.mxu1 }
 0x11f   : > { %v584_v9 = vadd.f32 %v548_v7, %v391_v1  ;;  %v588_v10 = vadd.f32 %v558_v8, %v395_v2 }
 0x120   : > { %607 = vst [vmem:[#allocation2 + $0x10] sm:$0xff] %v591_v5 }
 0x121   : > { %611 = vst [vmem:[#allocation2 + $0x78] sm:$0xff] %v595_v6 }
 0x122   : > { %600 = vst [vmem:[#allocation2 + $0x18] sm:$0xff] %v584_v9 }
 0x123   : > { %604 = vst [vmem:[#allocation2 + $0x48] sm:$0xff] %v588_v10 }
 0x125   : > { %v568_v13 = vpop.f32.mrf.mxu2  ;;  %v578_v14 = vpop.f32.mrf.mxu3 }
 0x126   : > { %v592_v15 = vadd.f32 %v568_v13, %v399_v11  ;;  %v596_v16 = vadd.f32 %v578_v14, %v403_v12 }
 0x128   : > { %608 = vst [vmem:[#allocation2 + $0x38] sm:$0xff] %v592_v15 }
 0x129   : > { %612 = vst [vmem:[#allocation2 + $0x28] sm:$0xff] %v596_v16 }
 0x12a PF: > { %p875_p0 = scmp.ne.s32.totalorder %s1090_s28, 3 }
 0x12c   : > { %616 = sbr.rel (%p875_p0) target bundleno = 321 (0x141), region = 85 }
 0x131   : > { %v617_v17 = vld [vmem:[#allocation2 + $0x30] sm:$0xff]  ;;  %v618_v18 = vld [vmem:[#allocation2] sm:$0xff]  ;;  %v619_v20 = vld [vmem:[#allocation2 + $0x58] sm:$0xff] }
 0x132   : > { %v1025_v19 = vld [vmem:[%s1299_s4] ss:$0 sm:$0xff]  ;;  %v620_v21 = vld [vmem:[#allocation2 + $0x18] sm:$0xff]  ;;  %v621_v22 = vld [vmem:[#allocation2 + $0x50] sm:$0xff] }
 0x133   : > { %v622_v23 = vld [vmem:[#allocation2 + $0x68] sm:$0xff]  ;;  %v637_v25 = vadd.f32 %v1025_v19, %v617_v17  ;;  %v638_v26 = vadd.f32 %v1025_v19, %v618_v18  ;;  %v639_v27 = vadd.f32 %v1025_v19, %v619_v20  ;;  %v640_v28 = vadd.f32 %v1025_v19, %v620_v21  ;;  %v625_v34 = vld [vmem:[#allocation2 + $0x40] sm:$0xff]  ;;  %v627_v40 = vld [vmem:[#allocation2 + $0x10] sm:$0xff] }
 0x134   : > { %v623_v24 = vld [vmem:[#allocation2 + $0x8] sm:$0xff]  ;;  %v641_v30 = vadd.f32 %v1025_v19, %v621_v22  ;;  %v642_v31 = vadd.f32 %v1025_v19, %v622_v23  ;;  %v626_v35 = vld [vmem:[#allocation2 + $0x20] sm:$0xff]  ;;  %v628_v41 = vld [vmem:[#allocation2 + $0x38] sm:$0xff]  ;;  %v645_v50 = vadd.f32 %v1025_v19, %v625_v34  ;;  %v647_v56 = vadd.f32 %v1025_v19, %v627_v40 }
 0x135   : > { %v624_v29 = vld [vmem:[#allocation2 + $0x48] sm:$0xff]  ;;  %v643_v32 = vadd.f32 %v1025_v19, %v623_v24  ;;  %v653_v36 = vmax.f32 %v637_v25, 0.0  ;;  %v654_v37 = vmax.f32 %v638_v26, 0.0  ;;  %v655_v38 = vmax.f32 %v639_v27, 0.0  ;;  %v629_v46 = vld [vmem:[#allocation2 + $0x60] sm:$0xff]  ;;  %v630_v47 = vld [vmem:[#allocation2 + $0x70] sm:$0xff] }
 0x136   : > { %v644_v33 = vadd.f32 %v1025_v19, %v624_v29  ;;  %v656_v39 = vmax.f32 %v640_v28, 0.0  ;;  %v657_v42 = vmax.f32 %v641_v30, 0.0  ;;  %v658_v43 = vmax.f32 %v642_v31, 0.0  ;;  %v631_v52 = vld [vmem:[#allocation2 + $0x78] sm:$0xff]  ;;  %v632_v53 = vld [vmem:[#allocation2 + $0x28] sm:$0xff] }
 0x137   : > { %v659_v44 = vmax.f32 %v643_v32, 0.0  ;;  %v898_v48 = vpack.c.bf16 %v654_v37, %v653_v36  ;;  %v646_v51 = vadd.f32 %v1025_v19, %v626_v35  ;;  %v648_v57 = vadd.f32 %v1025_v19, %v628_v41 }
 0x138   : > { %v660_v45 = vmax.f32 %v644_v33, 0.0  ;;  %v903_v49 = vpack.c.bf16 %v656_v39, %v655_v38  ;;  %v908_v54 = vpack.c.bf16 %v658_v43, %v657_v42  ;;  %v661_v58 = vmax.f32 %v645_v50, 0.0 }
 0x139   : > { %899 = vst [vmem:[%s1235_s22] sm:$0xff] %v898_v48   ;;  %v662_v59 = vmax.f32 %v646_v51, 0.0  ;;  %v649_v60 = vadd.f32 %v1025_v19, %v629_v46  ;;  %v650_v61 = vadd.f32 %v1025_v19, %v630_v47  ;;  %v663_v62 = vmax.f32 %v647_v56, 0.0 }
 0x13a   : > { %v913_v55 = vpack.c.bf16 %v660_v45, %v659_v44  ;;  %935 = vst [vmem:[%s1235_s22 + $0x8] sm:$0xff] %v903_v49   ;;  %v664_v63 = vmax.f32 %v648_v57, 0.0  ;;  %v651_v0 = vadd.f32 %v1025_v19, %v631_v52  ;;  %v652_v1 = vadd.f32 %v1025_v19, %v632_v53 }
 0x13b   : > { %936 = vst [vmem:[%s1235_s22 + $0x10] sm:$0xff] %v908_v54   ;;  %v918_v2 = vpack.c.bf16 %v662_v59, %v661_v58  ;;  %v665_v3 = vmax.f32 %v649_v60, 0.0  ;;  %v666_v4 = vmax.f32 %v650_v61, 0.0 }
 0x13c   : > { %937 = vst [vmem:[%s1235_s22 + $0x18] sm:$0xff] %v913_v55   ;;  %v923_v5 = vpack.c.bf16 %v664_v63, %v663_v62  ;;  %v667_v6 = vmax.f32 %v651_v0, 0.0  ;;  %v668_v7 = vmax.f32 %v652_v1, 0.0 }
 0x13d   : > { %938 = vst [vmem:[%s1235_s22 + $0x20] sm:$0xff] %v918_v2   ;;  %v928_v8 = vpack.c.bf16 %v666_v4, %v665_v3 }
 0x13e   : > { %939 = vst [vmem:[%s1235_s22 + $0x28] sm:$0xff] %v923_v5   ;;  %v933_v9 = vpack.c.bf16 %v668_v7, %v667_v6 }
 0x13f   : > { %940 = vst [vmem:[%s1235_s22 + $0x30] sm:$0xff] %v928_v8  }
 0x140   : > { %941 = vst [vmem:[%s1235_s22 + $0x38] sm:$0xff] %v933_v9  }
 0x141 PF: > { %s28_s30 = sadd.s32 1, %s1106_s30   ;;  %s1302_s26 = smov %s1086_s27 }
 0x142   : > { %p25_p1 = scmp.ge.s32.totalorder %s28_s30, 18   ;;  %s1303_s27 = smov %s1200_s18 }
 0x143   : > { %s1304_s28 = smov %s1098_s29  ;;  %s1305_s0 = smov %s1102_s1 }
 0x144   : > { %s1306_s29 = smov %s1311_s6  ;;  %s1307_s1 = smov %s1313_s7 }
 0x145   :  { %27 = sbr.rel (!%p25_p1) target bundleno = 11 (0xb), region = 123 }

</bundles_post_ra>
